<compile_context>
chip_gen: v5e
topology: v5e:2x2
jax: 0.10.0
libtpu: 0.0.40
codegen_flags: <defaults>
</compile_context>

<pallas_src>
import functools
import math

import jax
import jax.numpy as jnp
from jax import lax
from jax.experimental import pallas as pl
from jax.experimental.pallas import tpu as pltpu


LANE = 128
_TARGET_BLOCK_BYTES = 2 * 1024 * 1024   # ~2 MiB blocks: >=85% of HBM roofline per tile sweeps
_MAX_BLOCK_BYTES = 8 * 1024 * 1024      # 4 buffers (in+out, double-buffered) <= 32 MiB -> v7x safe


def _round_up(x, m):
    return (x + m - 1) // m * m


def _sublane(dtype):
    # f32 -> 8, bf16 -> 16, int8/fp8 -> 32 (packed dtypes pack along sublanes).
    return max(8, 32 // jnp.dtype(dtype).itemsize)


def _pick_tile(n_rows, lane, dtype, block_rows):
    """Rows-per-block: aim ~2 MiB, never exceed ~8 MiB, rounded to the sublane multiple."""
    sub = _sublane(dtype)
    row_bytes = max(1, lane * jnp.dtype(dtype).itemsize)
    target = max(block_rows, _TARGET_BLOCK_BYTES // row_bytes)
    cap = max(sub, _MAX_BLOCK_BYTES // row_bytes)
    tr = min(target, cap, _round_up(n_rows, sub))
    return max(sub, tr // sub * sub)


def _compiler_params(semantics, rows, lane, dtype):
    block_bytes = rows * lane * jnp.dtype(dtype).itemsize
    need = 4 * block_bytes + (8 << 20)          # in + out, double-buffered, + params/margin
    vmem = int(min(max(need, 32 << 20), 64 << 20))
    return pltpu.CompilerParams(dimension_semantics=semantics, vmem_limit_bytes=vmem)


def _segment_mask(feat, group):
    """Block-diagonal 0/1 mask so x @ mask gives per-segment sums broadcast over the segment."""
    lane = feat * group
    seg = jnp.arange(lane, dtype=jnp.int32) // feat
    return (seg[:, None] == seg[None, :]).astype(jnp.float32)


# ---------------------------------------------------------------------------
# Shared in-kernel math.
# ---------------------------------------------------------------------------
def _ln_math(x, scale, shift, seg, *, eps, feat):
    """x: (R, L) block; scale/shift: (1, L); seg: (L, L) mask or None (L == feat)."""
    x = x.astype(jnp.float32)
    scale = scale.astype(jnp.float32)
    shift = shift.astype(jnp.float32)
    if seg is None:
        # One pass over x for both cross-lane reductions.
        s1 = jnp.sum(x, axis=-1, keepdims=True)
        s2 = jnp.sum(x * x, axis=-1, keepdims=True)
    else:
        # Lane-packed case: per-segment sums via the (otherwise idle) MXU.
        s1 = jnp.dot(x, seg, preferred_element_type=jnp.float32,
                     precision=lax.Precision.HIGHEST)
        s2 = jnp.dot(x * x, seg, preferred_element_type=jnp.float32,
                     precision=lax.Precision.HIGHEST)
    mean = s1 * (1.0 / feat)
    var = jnp.maximum(s2 - mean * s1, 0.0) * (1.0 / (feat - 1))   # torch.std: ddof=1
    std = jnp.sqrt(var)
    inv = pl.reciprocal(std + eps, approx=False)                  # reciprocal of column + bcast mul
    return (x - mean) * inv * scale + shift


# ---------------------------------------------------------------------------
# Kernel bodies.
# ---------------------------------------------------------------------------
def _ln_kernel(x_ref, scale_ref, shift_ref, o_ref, *, eps, feat):
    o_ref[...] = _ln_math(x_ref[...], scale_ref[...], shift_ref[...], None,
                          eps=eps, feat=feat).astype(o_ref.dtype)


def _ln_kernel_packed(x_ref, scale_ref, shift_ref, seg_ref, o_ref, *, eps, feat):
    o_ref[...] = _ln_math(x_ref[...], scale_ref[...], shift_ref[...], seg_ref[...],
                          eps=eps, feat=feat).astype(o_ref.dtype)


def _cond_ln_kernel(x_ref, scale_ref, shift_ref, o_ref, *, eps, feat):
    o_ref[0] = _ln_math(x_ref[0], scale_ref[0], shift_ref[0], None,
                        eps=eps, feat=feat).astype(o_ref.dtype)


def _cond_ln_kernel_packed(x_ref, scale_ref, shift_ref, seg_ref, o_ref, *, eps, feat):
    o_ref[0] = _ln_math(x_ref[0], scale_ref[0], shift_ref[0], seg_ref[...],
                        eps=eps, feat=feat).astype(o_ref.dtype)


# ---------------------------------------------------------------------------
# Wrapper 1: plain LayerNorm over the last axis of x (any leading shape).
# ---------------------------------------------------------------------------
def layer_norm(x, gamma, beta, *, eps=1e-6, block_rows=512):
    orig_shape = x.shape
    feat = orig_shape[-1]
    if feat < 2:
        raise ValueError("features must be >= 2 (torch.std with ddof=1 is undefined otherwise).")

    x2 = x.reshape(-1, feat)
    n = x2.shape[0]

    # Lane packing: fold `group` rows into one 128-wide lane row when F is small.
    group = LANE // feat if (feat < LANE and LANE % feat == 0) else 1
    lane = group * feat

    n_p = -(-n // group)                                   # packed rows
    tr = _pick_tile(n_p, lane, x.dtype, block_rows)
    n_p_pad = _round_up(n_p, tr)

    pad_rows = n_p_pad * group - n
    if pad_rows:
        x2 = jnp.pad(x2, ((0, pad_rows), (0, 0)))          # zero rows -> output = beta; sliced off
    xp = x2.reshape(n_p_pad, lane)

    scale = jnp.tile(gamma.astype(jnp.float32).reshape(-1), group).reshape(1, lane)
    shift = jnp.tile(beta.astype(jnp.float32).reshape(-1), group).reshape(1, lane)

    in_specs = [
        pl.BlockSpec((tr, lane), lambda i: (i, 0)),
        pl.BlockSpec((1, lane), lambda i: (0, 0)),
        pl.BlockSpec((1, lane), lambda i: (0, 0)),
    ]
    args = [xp, scale, shift]
    if group == 1:
        kernel = functools.partial(_ln_kernel, eps=eps, feat=feat)
    else:
        kernel = functools.partial(_ln_kernel_packed, eps=eps, feat=feat)
        in_specs.append(pl.BlockSpec((lane, lane), lambda i: (0, 0)))
        args.append(_segment_mask(feat, group))

    out = pl.pallas_call(
        kernel,
        out_shape=jax.ShapeDtypeStruct((n_p_pad, lane), x.dtype),
        grid=(n_p_pad // tr,),
        in_specs=in_specs,
        out_specs=pl.BlockSpec((tr, lane), lambda i: (i, 0)),
        compiler_params=_compiler_params(("parallel",), tr, lane, x.dtype),
    )(*args)

    out = out.reshape(n_p_pad * group, feat)[:n]
    return out.reshape(orig_shape)


# ---------------------------------------------------------------------------
# Wrapper 2: conditional LayerNorm.  cond Linears are hoisted to one batched
# XLA matmul; kernel consumes per-batch [1, F] scale/shift rows.
# ---------------------------------------------------------------------------
def conditional_layer_norm(x, cond, gamma, beta, w_scale, b_scale, w_shift, b_shift,
                           *, eps=1e-6, block_rows=512):
    bsz, seq, feat = x.shape
    if feat < 2:
        raise ValueError("features must be >= 2 (torch.std with ddof=1 is undefined otherwise).")

    # Hoisted cond Linear layers: one [B,C] @ [C,2F] matmul (full-f32 precision).
    w = jnp.concatenate([w_scale, w_shift], axis=-1).astype(jnp.float32)      # [C, 2F]
    b = jnp.concatenate([b_scale, b_shift], axis=-1).astype(jnp.float32)      # [2F]
    cond_affine = jnp.dot(cond.astype(jnp.float32), w,
                          precision=lax.Precision.HIGHEST) + b                # [B, 2F]
    scale = gamma.astype(jnp.float32) + cond_affine[:, :feat]                 # [B, F]
    shift = beta.astype(jnp.float32) + cond_affine[:, feat:]                  # [B, F]

    group = LANE // feat if (feat < LANE and LANE % feat == 0) else 1
    lane = group * feat

    sp = -(-seq // group)                                   # packed seq rows per batch
    ts = _pick_tile(sp, lane, x.dtype, block_rows)
    sp_pad = _round_up(sp, ts)

    pad_seq = sp_pad * group - seq
    if pad_seq:
        x = jnp.pad(x, ((0, 0), (0, pad_seq), (0, 0)))
    xp = x.reshape(bsz, sp_pad, lane)

    scale_l = jnp.tile(scale, (1, group)).reshape(bsz, 1, lane)
    shift_l = jnp.tile(shift, (1, group)).reshape(bsz, 1, lane)

    in_specs = [
        pl.BlockSpec((1, ts, lane), lambda bi, si: (bi, si, 0)),
        pl.BlockSpec((1, 1, lane), lambda bi, si: (bi, 0, 0)),
        pl.BlockSpec((1, 1, lane), lambda bi, si: (bi, 0, 0)),
    ]
    args = [xp, scale_l, shift_l]
    if group == 1:
        kernel = functools.partial(_cond_ln_kernel, eps=eps, feat=feat)
    else:
        kernel = functools.partial(_cond_ln_kernel_packed, eps=eps, feat=feat)
        in_specs.append(pl.BlockSpec((lane, lane), lambda bi, si: (0, 0)))
        args.append(_segment_mask(feat, group))

    out = pl.pallas_call(
        kernel,
        out_shape=jax.ShapeDtypeStruct((bsz, sp_pad, lane), x.dtype),
        grid=(bsz, sp_pad // ts),
        in_specs=in_specs,
        out_specs=pl.BlockSpec((1, ts, lane), lambda bi, si: (bi, si, 0)),
        compiler_params=_compiler_params(("parallel", "parallel"), ts, lane, x.dtype),
    )(*args)

    out = out.reshape(bsz, sp_pad * group, feat)[:, :seq]
    return out


# ---------------------------------------------------------------------------
# Pure-JAX reference (mirrors the PyTorch forward) for verification.
# ---------------------------------------------------------------------------
def _ref_forward(x, gamma, beta, eps, cond=None, ws=None, bs=None, wh=None, bh=None):
    mean = jnp.mean(x, axis=-1, keepdims=True)
    std = jnp.std(x, axis=-1, keepdims=True, ddof=1)
    x_norm = (x - mean) / (std + eps)
    if cond is not None:
        cg = (jnp.dot(cond, ws, precision=lax.Precision.HIGHEST) + bs)[:, None, :]
        cb = (jnp.dot(cond, wh, precision=lax.Precision.HIGHEST) + bh)[:, None, :]
        return x_norm * (gamma + cg) + (beta + cb)
    return x_norm * gamma + beta


if __name__ == "__main__":
    eps = 1e-6
    key = jax.random.PRNGKey(0)
    kx, kx2, kc, kws, kbs, kwh, kbh = jax.random.split(key, 7)

    # ---- plain LayerNorm, small feature dim (exercises the lane-packed path, F=32 -> 4 rows/128 lanes)
    B, S, F = 2, 8, 32
    x = jax.random.normal(kx, (B, S, F), dtype=jnp.float32)
    gamma = jnp.ones((F,), jnp.float32)
    beta = jnp.zeros((F,), jnp.float32)
    out = layer_norm(x, gamma, beta, eps=eps)
    jax.block_until_ready(out)
    ref = _ref_forward(x, gamma, beta, eps)
    assert out.shape == x.shape
    assert jnp.allclose(out, ref, atol=2e-5, rtol=2e-5), float(jnp.max(jnp.abs(out - ref)))

    # ---- plain LayerNorm, lane-dense feature dim (group == 1 path)
    F2 = 256
    x2 = jax.random.normal(kx2, (B, S, F2), dtype=jnp.float32) * 2.0 + 0.5
    g2 = 1.0 + 0.1 * jnp.arange(F2, dtype=jnp.float32) / F2
    b2 = 0.05 * jnp.arange(F2, dtype=jnp.float32) / F2
    out2 = layer_norm(x2, g2, b2, eps=eps)
    jax.block_until_ready(out2)
    ref2 = _ref_forward(x2, g2, b2, eps)
    assert jnp.allclose(out2, ref2, atol=2e-5, rtol=2e-5), float(jnp.max(jnp.abs(out2 - ref2)))

    # ---- conditional LayerNorm (F=32, packed path)
    C = 16
    cond = jax.random.normal(kc, (B, C), dtype=jnp.float32)
    lim = 1.0 / math.sqrt(C)
    w_scale = jax.random.uniform(kws, (C, F), jnp.float32, -lim, lim)
    b_scale = jax.random.uniform(kbs, (F,), jnp.float32, -lim, lim)
    w_shift = jax.random.uniform(kwh, (C, F), jnp.float32, -lim, lim)
    b_shift = jax.random.uniform(kbh, (F,), jnp.float32, -lim, lim)
    out_c = conditional_layer_norm(x, cond, gamma, beta,
                                   w_scale, b_scale, w_shift, b_shift, eps=eps)
    jax.block_until_ready(out_c)
    ref_c = _ref_forward(x, gamma, beta, eps, cond, w_scale, b_scale, w_shift, b_shift)
    assert jnp.allclose(out_c, ref_c, atol=2e-5, rtol=2e-5), float(jnp.max(jnp.abs(out_c - ref_c)))

    # ---- conditional LayerNorm (F=128, lane-dense / group == 1 path)
    F3 = 128
    x3 = jax.random.normal(kx2, (B, S, F3), dtype=jnp.float32)
    g3 = jnp.ones((F3,), jnp.float32)
    b3 = jnp.zeros((F3,), jnp.float32)
    w_s3 = jax.random.uniform(kws, (C, F3), jnp.float32, -lim, lim)
    b_s3 = jax.random.uniform(kbs, (F3,), jnp.float32, -lim, lim)
    w_h3 = jax.random.uniform(kwh, (C, F3), jnp.float32, -lim, lim)
    b_h3 = jax.random.uniform(kbh, (F3,), jnp.float32, -lim, lim)
    out_c3 = conditional_layer_norm(x3, cond, g3, b3, w_s3, b_s3, w_h3, b_h3, eps=eps)
    jax.block_until_ready(out_c3)
    ref_c3 = _ref_forward(x3, g3, b3, eps, cond, w_s3, b_s3, w_h3, b_h3)
    assert jnp.allclose(out_c3, ref_c3, atol=2e-5, rtol=2e-5), float(jnp.max(jnp.abs(out_c3 - ref_c3)))

    print("KERNEL_OK")
</pallas_src>

<mosaic_0001>
module attributes {stable_mosaic.version = 11 : i64} {
  func.func @_ln_kernel_packed(%arg0: i32, %arg1: memref<8x128xf32, #tpu.memory_space<vmem>>, %arg2: memref<1x128xf32, #tpu.memory_space<vmem>>, %arg3: memref<1x128xf32, #tpu.memory_space<vmem>>, %arg4: memref<128x128xf32, #tpu.memory_space<vmem>>, %arg5: memref<8x128xf32, #tpu.memory_space<vmem>>) attributes {dimension_semantics = [#tpu.dimension_semantics<parallel>], iteration_bounds = array<i64: 1>, scalar_prefetch = 0 : i64, scratch_operands = 0 : i64, tpu.core_type = #tpu.core_type<tc>, window_params = [{transform_indices = @transform_0, window_bounds = array<i64: 8, 128>}, {pipeline_mode = #tpu.pipeline_mode<synchronous>, transform_indices = @transform_1, window_bounds = array<i64: 1, 128>}, {pipeline_mode = #tpu.pipeline_mode<synchronous>, transform_indices = @transform_2, window_bounds = array<i64: 1, 128>}, {pipeline_mode = #tpu.pipeline_mode<synchronous>, transform_indices = @transform_3, window_bounds = array<i64: 128, 128>}, {transform_indices = @transform_4, window_bounds = array<i64: 8, 128>}]} {
    %c0 = arith.constant 0 : index
    %c0_0 = arith.constant 0 : index
    %0 = vector.load %arg1[%c0, %c0_0] : memref<8x128xf32, #tpu.memory_space<vmem>>, vector<8x128xf32>
    %c0_1 = arith.constant 0 : index
    %c0_2 = arith.constant 0 : index
    %1 = vector.load %arg2[%c0_1, %c0_2] : memref<1x128xf32, #tpu.memory_space<vmem>>, vector<1x128xf32>
    %c0_3 = arith.constant 0 : index
    %c0_4 = arith.constant 0 : index
    %2 = vector.load %arg3[%c0_3, %c0_4] : memref<1x128xf32, #tpu.memory_space<vmem>>, vector<1x128xf32>
    %c0_5 = arith.constant 0 : index
    %c0_6 = arith.constant 0 : index
    %3 = vector.load %arg4[%c0_5, %c0_6] : memref<128x128xf32, #tpu.memory_space<vmem>>, vector<128x128xf32>
    %cst = arith.constant dense<0.000000e+00> : vector<8x128xf32>
    %4 = tpu.matmul %0, %3, %cst {dimension_numbers = #tpu.dot_dimension_numbers<[1], [0], [0], [1], [0, 0, 1, 1], [], []>, precision = #tpu.contract_precision<fp32>} : vector<8x128xf32>, vector<128x128xf32>, vector<8x128xf32> -> vector<8x128xf32>
    %5 = arith.mulf %0, %0 : vector<8x128xf32>
    %cst_7 = arith.constant dense<0.000000e+00> : vector<8x128xf32>
    %6 = tpu.matmul %5, %3, %cst_7 {dimension_numbers = #tpu.dot_dimension_numbers<[1], [0], [0], [1], [0, 0, 1, 1], [], []>, precision = #tpu.contract_precision<fp32>} : vector<8x128xf32>, vector<128x128xf32>, vector<8x128xf32> -> vector<8x128xf32>
    %cst_8 = arith.constant 3.125000e-02 : f32
    %7 = vector.broadcast %cst_8 : f32 to vector<8x128xf32>
    %8 = arith.mulf %4, %7 : vector<8x128xf32>
    %9 = arith.mulf %8, %4 : vector<8x128xf32>
    %10 = arith.subf %6, %9 : vector<8x128xf32>
    %cst_9 = arith.constant 0.000000e+00 : f32
    %11 = vector.broadcast %cst_9 : f32 to vector<8x128xf32>
    %12 = arith.maximumf %10, %11 : vector<8x128xf32>
    %cst_10 = arith.constant 0.0322580636 : f32
    %13 = vector.broadcast %cst_10 : f32 to vector<8x128xf32>
    %14 = arith.mulf %12, %13 : vector<8x128xf32>
    %15 = math.sqrt %14 : vector<8x128xf32>
    %cst_11 = arith.constant 9.99999997E-7 : f32
    %16 = vector.broadcast %cst_11 : f32 to vector<8x128xf32>
    %17 = arith.addf %15, %16 : vector<8x128xf32>
    %18 = tpu.reciprocal %17 : vector<8x128xf32> -> vector<8x128xf32>
    %19 = arith.subf %0, %8 : vector<8x128xf32>
    %20 = arith.mulf %19, %18 : vector<8x128xf32>
    %21 = vector.broadcast %1 : vector<1x128xf32> to vector<8x128xf32>
    %22 = arith.mulf %20, %21 : vector<8x128xf32>
    %23 = vector.broadcast %2 : vector<1x128xf32> to vector<8x128xf32>
    %24 = arith.addf %22, %23 : vector<8x128xf32>
    %c0_12 = arith.constant 0 : index
    %c0_13 = arith.constant 0 : index
    %25 = vector.load %arg5[%c0_12, %c0_13] : memref<8x128xf32, #tpu.memory_space<vmem>>, vector<8x128xf32>
    tpu.vector_store %arg5[%c0_12, %c0_13], %24 {strides = array<i32>} : memref<8x128xf32, #tpu.memory_space<vmem>>, vector<8x128xf32>,
    return
  }
  func.func @transform_0(%arg0: i32) -> (i32, i32) {
    %c0_i32 = arith.constant 0 : i32
    %c0_i32_0 = arith.constant 0 : i32
    return %arg0, %c0_i32 : i32, i32
  }
  func.func @transform_1(%arg0: i32) -> (i32, i32) {
    %c0_i32 = arith.constant 0 : i32
    %c0_i32_0 = arith.constant 0 : i32
    %c0_i32_1 = arith.constant 0 : i32
    return %c0_i32, %c0_i32_0 : i32, i32
  }
  func.func @transform_2(%arg0: i32) -> (i32, i32) {
    %c0_i32 = arith.constant 0 : i32
    %c0_i32_0 = arith.constant 0 : i32
    %c0_i32_1 = arith.constant 0 : i32
    return %c0_i32, %c0_i32_0 : i32, i32
  }
  func.func @transform_3(%arg0: i32) -> (i32, i32) {
    %c0_i32 = arith.constant 0 : i32
    %c0_i32_0 = arith.constant 0 : i32
    %c0_i32_1 = arith.constant 0 : i32
    return %c0_i32, %c0_i32_0 : i32, i32
  }
  func.func @transform_4(%arg0: i32) -> (i32, i32) {
    %c0_i32 = arith.constant 0 : i32
    %c0_i32_0 = arith.constant 0 : i32
    return %arg0, %c0_i32 : i32, i32
  }
}

</mosaic_0001>

<bundles_post_ra>
// kernel: tpu_custom_call.1
= control target key start
LH: loop header
LB: loop body
LE: loop exit
PB: predicated region body
PF: predicated region fallthrough
CT: control target
= control target key end

     0   :  { %9 = vsyncpa [#allocation3], 0  ;;  %s1387_s0 = inlined_call_operand.hbm [shape: f32[8,128], index: 0, kind: input, shape index: {}]   ;;  %s1388_s1 = inlined_call_operand.hbm [shape: f32[1,128], index: 1, kind: input, shape index: {}]   ;;  %s1389_s2 = inlined_call_operand.vmem [shape: f32[1,128], index: 2, kind: input, shape index: {}]   ;;  %s1390_s3 = inlined_call_operand.hbm [shape: f32[128,128], index: 3, kind: input, shape index: {}]   ;;  %s1391_s4 = inlined_call_operand.hbm [shape: f32[8,128], index: 4, kind: output, shape index: {}]  }
   0x1   :  { %10 = vsyncpa [#allocation6], 0  ;;  %s28_s17 = sshll.u32 %s1388_s1, 4  ;;  %s29_s17 = int_to_ptr.hbm [resolvable:$true] %s28_s17 }
   0x2   :  { %11 = vsyncpa [#allocation4], 0  ;;  %s938_s18 = smov [#allocation5]   ;;  %s17_s22 = sshll.u32 %s1387_s0, 4  ;;  %s18_s22 = int_to_ptr.hbm [resolvable:$true] %s17_s22 }
   0x3   :  { %s30_s19 = sshll.u32 %s938_s18, 4  ;;  %s939_s23 = smov [#allocation2]   ;;  %s31_s19 = int_to_ptr.vmem [resolvable:$true] %s30_s19 }
   0x4   :  { %33 = dma.hbm_to_vmem [thread:$0]  %s29_s17, 16, %s31_s19, [#allocation6]  }
   0x5   :  { %s19_s24 = sshll.u32 %s939_s23, 4  ;;  %s40_s27 = sshll.u32 %s1390_s3, 4  ;;  %s20_s24 = int_to_ptr.vmem [resolvable:$true] %s19_s24  ;;  %s41_s27 = int_to_ptr.hbm [resolvable:$true] %s40_s27 }
   0x6   :  { %22 = dma.hbm_to_vmem [thread:$0]  %s18_s22, 128, %s20_s24, [#allocation3]  }
   0x7   :  { %s940_s1 = smov [#allocation7]   ;;  %s941_s29 = smov 128  }
   0x8   :  { %s42_s28 = sshll.u32 %s940_s1, 4  ;;  %s942_s30 = smov 8   ;;  %s43_s28 = int_to_ptr.vmem [resolvable:$true] %s42_s28 }
   0x9   :  { %48 = dma.hbm_to_vmem [thread:$0]  %s41_s27, 2048, %s43_s28, [#allocation6], %s941_s29, %s941_s29, %s942_s30  }
   0xa   :  { %932 = dma.done.wait [#allocation3], 128  }
   0xb   :  { %933 = vsyncadd [#allocation3], 4294967168 }
   0xc   :  { %934 = dma.done.wait [#allocation6], 2064  }
   0xd   :  { %935 = vsyncadd [#allocation6], 4294965232  ;;  %v79_v0 = vld [vmem:[#allocation7 + $0x78] sm:$0xff]  ;;  %v78_v1 = vld [vmem:[#allocation7 + $0x70] sm:$0xff]  ;;  %s943_s5 = smov [#allocation8]   ;;  %s813_s9 = sshll.u32 %s1391_s4, 4  ;;  %s814_s9 = int_to_ptr.hbm [resolvable:$true] %s813_s9 }
   0xe   :  { %v77_v2 = vld [vmem:[#allocation7 + $0x68] sm:$0xff]  ;;  %v978_v3 = vand.u32 4294901760, %v79_v0  ;;  %v980_v4 = vand.u32 4294901760, %v78_v1  ;;  %v76_v6 = vld [vmem:[#allocation7 + $0x60] sm:$0xff]  ;;  %v75_v7 = vld [vmem:[#allocation7 + $0x58] sm:$0xff]  ;;  %s811_s6 = sshll.u32 %s943_s5, 4  ;;  %s812_s6 = int_to_ptr.vmem [resolvable:$true] %s811_s6 }
   0xf   :  { %v982_v5 = vand.u32 4294901760, %v77_v2  ;;  %v74_v8 = vld [vmem:[#allocation7 + $0x50] sm:$0xff]  ;;  %v984_v9 = vand.u32 4294901760, %v76_v6  ;;  %v986_v10 = vand.u32 4294901760, %v75_v7  ;;  %v73_v12 = vld [vmem:[#allocation7 + $0x48] sm:$0xff]  ;;  %v72_v13 = vld [vmem:[#allocation7 + $0x40] sm:$0xff] }
  0x10   :  { %v988_v11 = vand.u32 4294901760, %v74_v8  ;;  %81 = vmatpush.msra.mxu0 %v978_v3  ;;  %v992_v14 = vsub.f32 %v79_v0, %v978_v3  ;;  %v995_v15 = vsub.f32 %v78_v1, %v980_v4  ;;  %277 = vmatpush.msra.mxu3 %v978_v3  ;;  %v1001_v17 = vand.u32 4294901760, %v73_v12  ;;  %v71_v21 = vld [vmem:[#allocation7 + $0x38] sm:$0xff]  ;;  %v70_v34 = vld [vmem:[#allocation7 + $0x30] sm:$0xff]  ;;  %v69_v35 = vld [vmem:[#allocation7 + $0x28] sm:$0xff] }
  0x11   :  { %v999_v16 = vsub.f32 %v77_v2, %v982_v5  ;;  %v1004_v18 = vsub.f32 %v76_v6, %v984_v9  ;;  %v1007_v19 = vsub.f32 %v75_v7, %v986_v10  ;;  %v1023_v25 = vand.u32 4294901760, %v72_v13  ;;  %v68_v42 = vld [vmem:[#allocation7 + $0x20] sm:$0xff]  ;;  %v67_v48 = vld [vmem:[#allocation7 + $0x18] sm:$0xff]  ;;  %v66_v54 = vld [vmem:[#allocation7 + $0x10] sm:$0xff] }
  0x12   :  { %v1010_v20 = vsub.f32 %v74_v8, %v988_v11  ;;  %224 = vmatpush.msra.mxu2 %v992_v14  ;;  %83 = vmatpush.msra.mxu0 %v980_v4  ;;  %v1015_v22 = vand.u32 4294901760, %v992_v14  ;;  %v1018_v23 = vand.u32 4294901760, %v995_v15  ;;  %v1033_v28 = vsub.f32 %v73_v12, %v1001_v17  ;;  %v65_v60 = vld [vmem:[#allocation7 + $0x8] sm:$0xff]  ;;  %v64_v1 = vld [vmem:[#allocation7] sm:$0xff] }
  0x13   :  { %v1021_v24 = vand.u32 4294901760, %v999_v16  ;;  %279 = vmatpush.msra.mxu3 %v980_v4  ;;  %v1027_v26 = vand.u32 4294901760, %v1004_v18  ;;  %v1030_v27 = vand.u32 4294901760, %v1007_v19  ;;  %v1043_v32 = vand.u32 4294901760, %v71_v21 }
  0x14   :  { %227 = vmatpush.msra.mxu2 %v995_v15  ;;  %85 = vmatpush.msra.mxu0 %v982_v5  ;;  %v124_v29 = vsub.f32 %v992_v14, %v1015_v22  ;;  %v130_v30 = vsub.f32 %v995_v15, %v1018_v23  ;;  %v1047_v33 = vand.u32 4294901760, %v1010_v20  ;;  %v1058_v39 = vsub.f32 %v72_v13, %v1023_v25 }
  0x15   :  { %v136_v31 = vsub.f32 %v999_v16, %v1021_v24  ;;  %281 = vmatpush.msra.mxu3 %v982_v5  ;;  %v142_v38 = vsub.f32 %v1004_v18, %v1027_v26  ;;  %v148_v40 = vsub.f32 %v1007_v19, %v1030_v27  ;;  %v1064_v41 = vand.u32 4294901760, %v1033_v28 }
  0x16   :  { %v1049_v36 = vand.u32 4294901760, %v124_v29  ;;  %230 = vmatpush.msra.mxu2 %v999_v16  ;;  %87 = vmatpush.msra.mxu0 %v984_v9  ;;  %v1053_v37 = vand.u32 4294901760, %v130_v30  ;;  %v1071_v44 = vsub.f32 %v71_v21, %v1043_v32  ;;  %v1073_v45 = vand.u32 4294901760, %v70_v34 }
  0x17   :  { %283 = vmatpush.msra.mxu3 %v984_v9  ;;  %v1068_v43 = vand.u32 4294901760, %v136_v31  ;;  %v1075_v46 = vand.u32 4294901760, %v69_v35  ;;  %v154_v47 = vsub.f32 %v1010_v20, %v1047_v33  ;;  %v1083_v49 = vand.u32 4294901760, %v142_v38 }
  0x18   :  { %126 = vmatpush.msra.mxu1 %v1049_v36  ;;  %233 = vmatpush.msra.mxu2 %v1004_v18  ;;  %v1086_v50 = vand.u32 4294901760, %v1058_v39  ;;  %v1089_v51 = vsub.f32 %v70_v34, %v1073_v45  ;;  %v1091_v52 = vand.u32 4294901760, %v68_v42  ;;  %v160_v53 = vsub.f32 %v1033_v28, %v1064_v41 }
  0x19   :  { %89 = vmatpush.msra.mxu0 %v986_v10  ;;  %285 = vmatpush.msra.mxu3 %v986_v10  ;;  %v1099_v55 = vand.u32 4294901760, %v148_v40  ;;  %v1102_v56 = vand.u32 4294901760, %v1071_v44  ;;  %v1105_v57 = vsub.f32 %v69_v35, %v1075_v46  ;;  %v1107_v58 = vand.u32 4294901760, %v67_v48 }
  0x1a   :  { %132 = vmatpush.msra.mxu1 %v1053_v37  ;;  %236 = vmatpush.msra.mxu2 %v1007_v19  ;;  %v1110_v59 = vand.u32 4294901760, %v154_v47  ;;  %v166_v61 = vsub.f32 %v1058_v39, %v1086_v50  ;;  %v1118_v62 = vand.u32 4294901760, %v1089_v51  ;;  %v1121_v63 = vsub.f32 %v68_v42, %v1091_v52 }
  0x1b   :  { %91 = vmatpush.msra.mxu0 %v988_v11  ;;  %287 = vmatpush.msra.mxu3 %v988_v11  ;;  %v1123_v0 = vand.u32 4294901760, %v66_v54  ;;  %v1126_v2 = vand.u32 4294901760, %v160_v53  ;;  %v172_v6 = vsub.f32 %v1071_v44, %v1102_v56  ;;  %v1134_v7 = vand.u32 4294901760, %v1105_v57 }
  0x1c   :  { %138 = vmatpush.msra.mxu1 %v1068_v43  ;;  %239 = vmatpush.msra.mxu2 %v1010_v20  ;;  %1394 = vst [vmem:[#allocation12_spill] sm:$0xff] %v1121_v63  ;;  %v1137_v8 = vsub.f32 %v67_v48, %v1107_v58  ;;  %v1139_v12 = vand.u32 4294901760, %v65_v60  ;;  %v1143_v13 = vand.u32 4294901760, %v64_v1  ;;  %v1147_v21 = vand.u32 4294901760, %v166_v61 }
  0x1d   :  { %93 = vmatpush.msra.mxu0 %v1001_v17  ;;  %289 = vmatpush.msra.mxu3 %v1001_v17  ;;  %v178_v29 = vsub.f32 %v1089_v51, %v1118_v62  ;;  %v1152_v30 = vand.u32 4294901760, %v1121_v63  ;;  %v1155_v31 = vsub.f32 %v66_v54, %v1123_v0  ;;  %v1161_v34 = vand.u32 4294901760, %v172_v6 }
  0x1e   :  { %144 = vmatpush.msra.mxu1 %v1083_v49  ;;  %242 = vmatpush.msra.mxu2 %v1033_v28  ;;  %1395 = vst [vmem:[#allocation13_spill] sm:$0xff] %v1137_v8  ;;  %v184_v35 = vsub.f32 %v1105_v57, %v1134_v7  ;;  %v1166_v38 = vand.u32 4294901760, %v1137_v8  ;;  %v1169_v40 = vsub.f32 %v65_v60, %v1139_v12 }
  0x1f   :  { %95 = vmatpush.msra.mxu0 %v1023_v25  ;;  %291 = vmatpush.msra.mxu3 %v1023_v25  ;;  %v1175_v42 = vand.u32 4294901760, %v178_v29  ;;  %v190_v47 = vsub.f32 %v1121_v63, %v1152_v30  ;;  %v1180_v48 = vand.u32 4294901760, %v1155_v31  ;;  %v1183_v53 = vsub.f32 %v64_v1, %v1143_v13 }
  0x20   :  { %150 = vmatpush.msra.mxu1 %v1099_v55  ;;  %245 = vmatpush.msra.mxu2 %v1058_v39  ;;  %v1189_v54 = vand.u32 4294901760, %v184_v35  ;;  %v196_v60 = vsub.f32 %v1137_v8, %v1166_v38  ;;  %v1194_v61 = vand.u32 4294901760, %v1169_v40 }
  0x21   :  { %97 = vmatpush.msra.mxu0 %v1043_v32  ;;  %293 = vmatpush.msra.mxu3 %v1043_v32  ;;  %v1200_v1 = vand.u32 4294901760, %v190_v47  ;;  %v202_v6 = vsub.f32 %v1155_v31, %v1180_v48  ;;  %v1205_v29 = vand.u32 4294901760, %v1183_v53 }
  0x22   :  { %156 = vmatpush.msra.mxu1 %v1110_v59  ;;  %248 = vmatpush.msra.mxu2 %v1071_v44  ;;  %v1211_v35 = vand.u32 4294901760, %v196_v60  ;;  %v208_v47 = vsub.f32 %v1169_v40, %v1194_v61 }
  0x23   :  { %99 = vmatpush.msra.mxu0 %v1073_v45  ;;  %295 = vmatpush.msra.mxu3 %v1073_v45 }
  0x24   :  { %162 = vmatpush.msra.mxu1 %v1126_v2  ;;  %251 = vmatpush.msra.mxu2 %v1089_v51  ;;  %v1227_v60 = vand.u32 4294901760, %v208_v47 }
  0x25   :  { %101 = vmatpush.msra.mxu0 %v1075_v46  ;;  %297 = vmatpush.msra.mxu3 %v1075_v46 }
  0x26   :  { %168 = vmatpush.msra.mxu1 %v1147_v21  ;;  %254 = vmatpush.msra.mxu2 %v1105_v57 }
  0x27   :  { %103 = vmatpush.msra.mxu0 %v1091_v52  ;;  %299 = vmatpush.msra.mxu3 %v1091_v52 }
  0x28   :  { %174 = vmatpush.msra.mxu1 %v1161_v34  ;;  %257 = vmatpush.msra.mxu2 %v1121_v63  ;;  %v214_v63 = vsub.f32 %v1183_v53, %v1205_v29 }
  0x29   :  { %105 = vmatpush.msra.mxu0 %v1107_v58  ;;  %301 = vmatpush.msra.mxu3 %v1107_v58 }
  0x2a   :  { %180 = vmatpush.msra.mxu1 %v1175_v42  ;;  %260 = vmatpush.msra.mxu2 %v1137_v8  ;;  %v1219_v8 = vand.u32 4294901760, %v202_v6  ;;  %v1233_v6 = vand.u32 4294901760, %v214_v63 }
  0x2b   :  { %107 = vmatpush.msra.mxu0 %v1123_v0  ;;  %303 = vmatpush.msra.mxu3 %v1123_v0 }
  0x2c   :  { %186 = vmatpush.msra.mxu1 %v1189_v54  ;;  %263 = vmatpush.msra.mxu2 %v1155_v31 }
  0x2d   :  { %109 = vmatpush.msra.mxu0 %v1139_v12  ;;  %305 = vmatpush.msra.mxu3 %v1139_v12 }
  0x2e   :  { %192 = vmatpush.msra.mxu1 %v1200_v1  ;;  %266 = vmatpush.msra.mxu2 %v1169_v40 }
  0x2f   :  { %111 = vmatpush.msra.mxu0 %v1143_v13  ;;  %307 = vmatpush.msra.mxu3 %v1143_v13 }
  0x30   :  { %198 = vmatpush.msra.mxu1 %v1211_v35  ;;  %269 = vmatpush.msra.mxu2 %v1183_v53 }
  0x31   :  { %318 = vmatpush.msrb.mxu0 %v1015_v22  ;;  %468 = vmatpush.msrb.mxu3 %v1049_v36  ;;  %v1247_v36 = vld [vmem:[#allocation2] sm:$0xff] }
  0x32   :  { %423 = vmatpush.msrb.mxu2 %v978_v3  ;;  %204 = vmatpush.msra.mxu1 %v1219_v8  ;;  %v421_v63 = vmul.f32 %v1247_v36, %v1247_v36 }
  0x33   :  { %322 = vmatpush.msrb.mxu0 %v1018_v23  ;;  %474 = vmatpush.msrb.mxu3 %v1053_v37  ;;  %v1256_v37 = vand.u32 4294901760, %v1247_v36 }
  0x34   :  { %425 = vmatpush.msrb.mxu2 %v980_v4  ;;  %210 = vmatpush.msra.mxu1 %v1227_v60 }
  0x35   :  { %326 = vmatpush.msrb.mxu0 %v1021_v24  ;;  %480 = vmatpush.msrb.mxu3 %v1068_v43  ;;  %v113_v43 = vsub.f32 %v1247_v36, %v1256_v37 }
  0x36   :  { %427 = vmatpush.msrb.mxu2 %v982_v5  ;;  %216 = vmatpush.msra.mxu1 %v1233_v6 }
  0x37   :  { %330 = vmatpush.msrb.mxu0 %v1027_v26  ;;  %486 = vmatpush.msrb.mxu3 %v1083_v49  ;;  %v114_v49 = vand.u32 4294901760, %v113_v43 }
  0x38   :  { %385 = vmatpush.msrb.mxu1 %v978_v3  ;;  %429 = vmatpush.msrb.mxu2 %v984_v9 }
  0x39   :  { %334 = vmatpush.msrb.mxu0 %v1030_v27  ;;  %492 = vmatpush.msrb.mxu3 %v1099_v55  ;;  %v115_v55 = vsub.f32 %v113_v43, %v114_v49 }
  0x3a   :  { %387 = vmatpush.msrb.mxu1 %v980_v4  ;;  %431 = vmatpush.msrb.mxu2 %v986_v10 }
  0x3b   :  { %338 = vmatpush.msrb.mxu0 %v1047_v33  ;;  %498 = vmatpush.msrb.mxu3 %v1110_v59  ;;  %v116_v59 = vand.u32 4294901760, %v115_v55 }
  0x3c   :  { %389 = vmatpush.msrb.mxu1 %v982_v5  ;;  %433 = vmatpush.msrb.mxu2 %v988_v11 }
  0x3d   :  { %342 = vmatpush.msrb.mxu0 %v1064_v41  ;;  %504 = vmatpush.msrb.mxu3 %v1126_v2 }
  0x3e   :  { %391 = vmatpush.msrb.mxu1 %v984_v9  ;;  %435 = vmatpush.msrb.mxu2 %v1001_v17 }
  0x3f   :  { %346 = vmatpush.msrb.mxu0 %v1086_v50  ;;  %510 = vmatpush.msrb.mxu3 %v1147_v21 }
  0x40   :  { %393 = vmatpush.msrb.mxu1 %v986_v10  ;;  %437 = vmatpush.msrb.mxu2 %v1023_v25 }
  0x41   :  { %350 = vmatpush.msrb.mxu0 %v1102_v56  ;;  %516 = vmatpush.msrb.mxu3 %v1161_v34 }
  0x42   :  { %395 = vmatpush.msrb.mxu1 %v988_v11  ;;  %439 = vmatpush.msrb.mxu2 %v1043_v32 }
  0x43   :  { %354 = vmatpush.msrb.mxu0 %v1118_v62  ;;  %522 = vmatpush.msrb.mxu3 %v1175_v42 }
  0x44   :  { %397 = vmatpush.msrb.mxu1 %v1001_v17  ;;  %441 = vmatpush.msrb.mxu2 %v1073_v45 }
  0x45   :  { %358 = vmatpush.msrb.mxu0 %v1134_v7  ;;  %528 = vmatpush.msrb.mxu3 %v1189_v54 }
  0x46   :  { %399 = vmatpush.msrb.mxu1 %v1023_v25  ;;  %443 = vmatpush.msrb.mxu2 %v1075_v46 }
  0x47   :  { %362 = vmatpush.msrb.mxu0 %v1152_v30  ;;  %534 = vmatpush.msrb.mxu3 %v1200_v1 }
  0x48   :  { %401 = vmatpush.msrb.mxu1 %v1043_v32  ;;  %445 = vmatpush.msrb.mxu2 %v1091_v52 }
  0x49   :  { %366 = vmatpush.msrb.mxu0 %v1166_v38  ;;  %540 = vmatpush.msrb.mxu3 %v1211_v35 }
  0x4a   :  { %403 = vmatpush.msrb.mxu1 %v1073_v45  ;;  %447 = vmatpush.msrb.mxu2 %v1107_v58 }
  0x4b   :  { %370 = vmatpush.msrb.mxu0 %v1180_v48  ;;  %546 = vmatpush.msrb.mxu3 %v1219_v8 }
  0x4c   :  { %405 = vmatpush.msrb.mxu1 %v1075_v46  ;;  %449 = vmatpush.msrb.mxu2 %v1123_v0 }
  0x4d   :  { %272 = vmatmul.f32.vlgmr.msra.gmra.mxu2 %v113_v43  ;;  %374 = vmatpush.msrb.mxu0 %v1194_v61  ;;  %v831_v43 = vld [vmem:[%s1389_s2] ss:$0 sm:$0xff] }
  0x4e   :  { %407 = vmatpush.msrb.mxu1 %v1091_v52  ;;  %451 = vmatpush.msrb.mxu2 %v1139_v12 }
  0x4f   :  { %117 = vmatmul.f32.vlgmr.msra.gmra.mxu0 %v116_v59  ;;  %311 = vmatmul.f32.vlgmr.msra.gmra.mxu3 %v114_v49 }
  0x50   :  { %409 = vmatpush.msrb.mxu1 %v1107_v58  ;;  %378 = vmatpush.msrb.mxu0 %v1205_v29 }
  0x51   :  { %453 = vmatpush.msrb.mxu2 %v1143_v13  ;;  %552 = vmatpush.msrb.mxu3 %v1227_v60  ;;  %v830_v60 = vld [vmem:[#allocation5] ss:$0 sm:$0xff] }
  0x52   :  { %411 = vmatpush.msrb.mxu1 %v1123_v0  ;;  %566 = vmatpush.msra.mxu0 %v992_v14  ;;  %v1317_v14 = vand.u32 4294901760, %v421_v63 }
  0x53   :  { %218 = vmatmul.f32.vlgmr.msra.gmra.mxu1 %v1256_v37  ;;  %660 = vmatpush.msra.mxu2 %v1015_v22 }
  0x54   :  { %413 = vmatpush.msrb.mxu1 %v1139_v12  ;;  %558 = vmatpush.msrb.mxu3 %v1233_v6 }
  0x55   :  { %569 = vmatpush.msra.mxu0 %v995_v15  ;;  %664 = vmatpush.msra.mxu2 %v1018_v23 }
  0x56   :  { %727 = vmatpush.msra.mxu3 %v978_v3  ;;  %415 = vmatpush.msrb.mxu1 %v1143_v13 }
  0x57   :  { %572 = vmatpush.msra.mxu0 %v999_v16  ;;  %668 = vmatpush.msra.mxu2 %v1021_v24 }
  0x58   :  { %619 = vmatpush.msra.mxu1 %v978_v3  ;;  %729 = vmatpush.msra.mxu3 %v980_v4  ;;  %v455_v3 = vsub.f32 %v421_v63, %v1317_v14 }
  0x59   :  { %380 = vmatmul.f32.vlgmr.msrb.gmra.mxu0 %v1256_v37  ;;  %672 = vmatpush.msra.mxu2 %v1027_v26 }
  0x5a   :  { %621 = vmatpush.msra.mxu1 %v980_v4  ;;  %575 = vmatpush.msra.mxu0 %v1004_v18  ;;  %v456_v4 = vand.u32 4294901760, %v455_v3 }
  0x5b   :  { %731 = vmatpush.msra.mxu3 %v982_v5  ;;  %417 = vmatmul.f32.vlgmr.msrb.gmra.mxu1 %v1256_v37 }
  0x5c   :  { %578 = vmatpush.msra.mxu0 %v1007_v19  ;;  %623 = vmatpush.msra.mxu1 %v982_v5  ;;  %v457_v5 = vsub.f32 %v455_v3, %v456_v4 }
  0x5d   :  { %676 = vmatpush.msra.mxu2 %v1030_v27  ;;  %733 = vmatpush.msra.mxu3 %v984_v9 }
  0x5e   :  { %581 = vmatpush.msra.mxu0 %v1010_v20  ;;  %625 = vmatpush.msra.mxu1 %v984_v9  ;;  %v458_v9 = vand.u32 4294901760, %v457_v5 }
  0x5f   :  { %680 = vmatpush.msra.mxu2 %v1047_v33  ;;  %735 = vmatpush.msra.mxu3 %v986_v10 }
  0x60   :  { %584 = vmatpush.msra.mxu0 %v1033_v28  ;;  %627 = vmatpush.msra.mxu1 %v986_v10  ;;  %v1396_v10 = vld [vmem:[#allocation12_spill] sm:$0xff] }
  0x61   :  { %684 = vmatpush.msra.mxu2 %v1064_v41  ;;  %737 = vmatpush.msra.mxu3 %v988_v11 }
  0x62   :  { %587 = vmatpush.msra.mxu0 %v1058_v39  ;;  %629 = vmatpush.msra.mxu1 %v988_v11  ;;  %v1397_v11 = vld [vmem:[#allocation13_spill] sm:$0xff] }
  0x63   :  { %688 = vmatpush.msra.mxu2 %v1086_v50  ;;  %739 = vmatpush.msra.mxu3 %v1001_v17 }
  0x64   :  { %590 = vmatpush.msra.mxu0 %v1071_v44  ;;  %631 = vmatpush.msra.mxu1 %v1001_v17 }
  0x65   :  { %692 = vmatpush.msra.mxu2 %v1102_v56  ;;  %741 = vmatpush.msra.mxu3 %v1023_v25 }
  0x66   :  { %593 = vmatpush.msra.mxu0 %v1089_v51  ;;  %633 = vmatpush.msra.mxu1 %v1023_v25 }
  0x67   :  { %696 = vmatpush.msra.mxu2 %v1118_v62  ;;  %743 = vmatpush.msra.mxu3 %v1043_v32 }
  0x68   :  { %596 = vmatpush.msra.mxu0 %v1105_v57  ;;  %635 = vmatpush.msra.mxu1 %v1043_v32 }
  0x69   :  { %700 = vmatpush.msra.mxu2 %v1134_v7  ;;  %745 = vmatpush.msra.mxu3 %v1073_v45 }
  0x6a   :  { %599 = vmatpush.msra.mxu0 %v1396_v10  ;;  %637 = vmatpush.msra.mxu1 %v1073_v45 }
  0x6b   :  { %704 = vmatpush.msra.mxu2 %v1152_v30  ;;  %747 = vmatpush.msra.mxu3 %v1075_v46 }
  0x6c   :  { %459 = vmatmul.f32.vlgmr.msrb.gmra.mxu2 %v458_v9  ;;  %560 = vmatmul.f32.vlgmr.msrb.gmra.mxu3 %v1317_v14 }
  0x6d   :  { %602 = vmatpush.msra.mxu0 %v1397_v11  ;;  %639 = vmatpush.msra.mxu1 %v1075_v46 }
  0x6e   :  { %708 = vmatpush.msra.mxu2 %v1166_v38  ;;  %749 = vmatpush.msra.mxu3 %v1091_v52 }
  0x6f   :  { %605 = vmatpush.msra.mxu0 %v1155_v31  ;;  %641 = vmatpush.msra.mxu1 %v1091_v52 }
  0x70   :  { %712 = vmatpush.msra.mxu2 %v1180_v48  ;;  %751 = vmatpush.msra.mxu3 %v1107_v58 }
  0x71   :  { %608 = vmatpush.msra.mxu0 %v1169_v40  ;;  %643 = vmatpush.msra.mxu1 %v1107_v58 }
  0x72   :  { %716 = vmatpush.msra.mxu2 %v1194_v61  ;;  %753 = vmatpush.msra.mxu3 %v1123_v0 }
  0x73   :  { %611 = vmatpush.msra.mxu0 %v1183_v53  ;;  %645 = vmatpush.msra.mxu1 %v1123_v0 }
  0x74   :  { %720 = vmatpush.msra.mxu2 %v1205_v29  ;;  %755 = vmatpush.msra.mxu3 %v1139_v12 }
  0x75   :  { %614 = vmatmul.f32.vlgmr.msra.gmra.mxu0 %v455_v3  ;;  %722 = vmatmul.f32.vlgmr.msra.gmra.mxu2 %v1317_v14 }
  0x76   :  { %647 = vmatpush.msra.mxu1 %v1139_v12  ;;  %757 = vmatpush.msra.mxu3 %v1143_v13 }
  0x77   :  { %759 = vmatmul.f32.vlgmr.msra.gmra.mxu3 %v1317_v14 }
  0x78   :  { %649 = vmatpush.msra.mxu1 %v1143_v13 }
  0x79   :  { %653 = vmatmul.f32.vlgmr.msra.gmra.mxu1 %v456_v4 }
  0xcc   :  { %v118_v15 = vpop.f32.mrf.mxu0 }
  0xd0   :  { %v219_v16 = vpop.f32.mrf.mxu1  ;;  %v273_v18 = vpop.f32.mrf.mxu2 }
  0xd1   :  { %v220_v17 = vadd.f32 %v219_v16, %v118_v15 }
  0xd2   :  { %v312_v20 = vpop.f32.mrf.mxu3 }
  0xd3   :  { %v274_v19 = vadd.f32 %v273_v18, %v220_v17 }
  0xd5   :  { %v313_v23 = vadd.f32 %v312_v20, %v274_v19 }
  0xd6   :  { %v381_v22 = vpop.f32.mrf.mxu0 }
  0xd7   :  { %v382_v25 = vadd.f32 %v381_v22, %v313_v23 }
  0xd8   :  { %v418_v24 = vpop.f32.mrf.mxu1 }
  0xd9   :  { %v419_v33 = vadd.f32 %v418_v24, %v382_v25 }
  0xdb   :  { %v763_v44 = vmul.f32 0.03125, %v419_v33 }
  0xdd   :  { %v764_v52 = vmul.f32 %v763_v44, %v419_v33  ;;  %v795_v35 = vsub.f32 %v1247_v36, %v763_v44 }
  0xef   :  { %v460_v26 = vpop.f32.mrf.mxu2  ;;  %v561_v27 = vpop.f32.mrf.mxu3 }
  0xf0   :  { %v562_v28 = vadd.f32 %v561_v27, %v460_v26 }
  0xf2   :  { %v615_v32 = vpop.f32.mrf.mxu0 }
  0xf3   :  { %v616_v39 = vadd.f32 %v615_v32, %v562_v28 }
  0xf6   :  { %v654_v41 = vpop.f32.mrf.mxu1 }
  0xf7   :  { %v655_v45 = vadd.f32 %v654_v41, %v616_v39 }
  0xf8   :  { %v723_v46 = vpop.f32.mrf.mxu2 }
  0xf9   :  { %v724_v50 = vadd.f32 %v723_v46, %v655_v45 }
  0xfa   :  { %v760_v51 = vpop.f32.mrf.mxu3 }
  0xfb   :  { %v761_v56 = vadd.f32 %v760_v51, %v724_v50 }
  0xfd   :  { %v765_v57 = vsub.f32 %v761_v56, %v764_v52 }
  0xff   :  { %v766_v58 = vmax.f32 %v765_v57, 0.0 }
 0x101   :  { %v767_v62 = vmul.f32 0.032258064, %v766_v58 }
 0x103   :  { %832 = vrsqrt.f32 %v767_v62  ;;  %vm775_vm0 = vcmp.eq.f32.partialorder %v767_v62, inf  ;;  %v778_v30 = vand.u32 2147483648, %v767_v62  ;;  %vm777_vm1 = vcmp.eq.f32.partialorder %v767_v62, 0.0 }
 0x109   :  { %v833_v0 = vpop.eup %832 }
 0x10a   :  { %v769_v2 = vmul.f32 %v833_v0, %v767_v62 }
 0x10c   :  { %v770_v7 = vmul.f32 %v833_v0, %v769_v2 }
 0x10e   :  { %v771_v8 = vmul.f32 0.5, %v770_v7 }
 0x110   :  { %v772_v12 = vsub.f32 1.5, %v771_v8 }
 0x112   :  { %v773_v13 = vmul.f32 %v833_v0, %v772_v12 }
 0x114   :  { %v774_v21 = vmul.f32 %v773_v13, %v767_v62 }
 0x116   :  { %v776_v31 = vsel %vm775_vm0, %v767_v62, %v774_v21 }
 0x117   :  { %v779_v34 = vsel %vm777_vm1, %v778_v30, %v776_v31 }
 0x118   :  { %v780_v38 = vadd.f32 1e-06, %v779_v34 }
 0x11a   :  { %834 = vrcp.f32 %v780_v38  ;;  %v792_v53 = vand.u32 2147483648, %v780_v38  ;;  %v790_v61 = vand.u32 2147483647, %v780_v38  ;;  %vm786_vm3 = vweird.f32 %v780_v38 }
 0x11c   :  { %v793_v29 = vor.u32 1.1754944e-38, %v792_v53  ;;  %vm791_vm5 = vcmp.eq.f32.partialorder %v790_v61, 8.507059e+37 }
 0x120   :  { %v835_v40 = vpop.eup %834 }
 0x121   :  { %v782_v42 = vmul.f32 %v835_v40, %v780_v38  ;;  %vm787_vm2 = vweird.f32 %v835_v40 }
 0x122   :  { %vm788_vm4 = vmor %vm786_vm3, %vm787_vm2 }
 0x123   :  { %v783_v48 = vsub.f32 1.0, %v782_v42 }
 0x125   :  { %v784_v54 = vmul.f32 %v835_v40, %v783_v48 }
 0x127   :  { %v785_v1 = vadd.f32 %v835_v40, %v784_v54 }
 0x129   :  { %v789_v47 = vsel %vm788_vm4, %v835_v40, %v785_v1 }
 0x12a   :  { %v794_v6 = vsel %vm791_vm5, %v793_v29, %v789_v47 }
 0x12b   :  { %v796_v37 = vmul.f32 %v795_v35, %v794_v6 }
 0x12d   :  { %v800_v49 = vmul.f32 %v830_v60, %v796_v37 }
 0x12f   :  { %v804_v55 = vadd.f32 %v831_v43, %v800_v49 }
 0x131   :  { %805 = vst [vmem:[#allocation8] sm:$0xff] %v804_v55 }
 0x132   :  { %816 = dma.vmem_to_hbm [thread:$0]  %s812_s6, 128, %s814_s9, [#allocation4]  }
 0x133   :  { %936 = dma.done.wait [#allocation4], 128  }
 0x134   :  { %937 = vsyncadd [#allocation4], 4294967168 }
 0x135   :  { %821 = vsyncpa [#allocation3], 1 }
 0x136   :  { %822 = vsyncpa [#allocation6], 1 }
 0x137   :  { %823 = vsyncpa [#allocation4], 1 }

</bundles_post_ra>
